<compile_context>
chip_gen: v7x
topology: tpu7x:2x2x1
jax: 0.10.0
libtpu: 0.0.40
codegen_flags: <defaults>
</compile_context>

<pallas_src>
import functools

import jax
import jax.numpy as jnp
from jax.experimental import pallas as pl
from jax.experimental.pallas import tpu as pltpu


def _round_up(n: int, m: int) -> int:
    return ((n + m - 1) // m) * m


def _cdiv(a: int, b: int) -> int:
    return (a + b - 1) // b


def _tpu_defaults():
    """Generation-aware tile sizes / scoped-VMEM budgets."""
    try:
        kind = jax.devices()[0].device_kind.lower()
    except Exception:
        kind = ""
    if "v7" in kind:
        # 64 MiB physical VMEM per TC -> leave headroom; roofline knee ~311 rows.
        return dict(block_rows=512, block_v=1024, vmem_limit=52 * 1024 * 1024)
    if "v6" in kind or "trillium" in kind:
        # 128 MiB VMEM; bf16 compute/HBM crossover ~700 rows -> big row tiles.
        return dict(block_rows=1024, block_v=1024, vmem_limit=104 * 1024 * 1024)
    if "v5 lite" in kind or "v5lite" in kind or "v5e" in kind:
        # Crossover ~240 rows; spend spare VMEM on a wider vocab tile instead.
        return dict(block_rows=256, block_v=2048, vmem_limit=100 * 1024 * 1024)
    # Conservative default for unknown hardware.
    return dict(block_rows=512, block_v=1024, vmem_limit=64 * 1024 * 1024)


def _output_prob_kernel(x_ref, k_ref, b_ref, w_ref, bias_ref, o_ref, *, matmul_dtype):
    # x_ref: (TM, D)  k_ref/b_ref: (1, D)  w_ref: (D, TV)  bias_ref: (1, TV)
    # o_ref: (TM, TV)
    #
    # Normalization is recomputed every (row, vocab) step: its VPU/XLU cost is
    # tiny next to the (TM,D)x(D,TV) matmul / weight DMA, and recomputing
    # removes any cross-step ordering so both grid axes can run "parallel".
    x = x_ref[...].astype(jnp.float32)
    d = x.shape[-1]
    mean = jnp.mean(x, axis=-1, keepdims=True)
    centered = x - mean
    # torch.std default is unbiased -> divide by (d - 1)
    var_unbiased = jnp.sum(centered * centered, axis=-1, keepdims=True) / (d - 1)
    std = jnp.sqrt(var_unbiased)
    xn = centered / (std + 1e-5)          # exact (matches PyTorch); off hot path
    y = k_ref[...].astype(jnp.float32) * xn + b_ref[...].astype(jnp.float32)

    out = jnp.dot(y.astype(matmul_dtype), w_ref[...],
                  preferred_element_type=jnp.float32)
    out = out + bias_ref[...].astype(jnp.float32)
    o_ref[...] = out.astype(o_ref.dtype)


def prepare_lm_head_weight(w, bias, *, matmul_dtype=jnp.bfloat16, block_v=None):
    """One-time weight prep, OFF the forward hot path.

    PyTorch (V, D) weight -> (D, V_padded) in the matmul dtype; bias ->
    (1, V_padded) f32; vocab dim padded to a multiple of the vocab tile so the
    forward never copies the lm_head weight again.
    """
    if block_v is None:
        block_v = _tpu_defaults()["block_v"]
    V, D = w.shape
    tv = min(block_v, _round_up(V, 128))
    v_p = _round_up(V, tv)
    w_t = jnp.transpose(w).astype(matmul_dtype)
    bias2d = jnp.asarray(bias).reshape(1, V).astype(jnp.float32)
    if v_p != V:
        w_t = jnp.pad(w_t, ((0, 0), (0, v_p - V)))
        bias2d = jnp.pad(bias2d, ((0, 0), (0, v_p - V)))
    return w_t, bias2d


@functools.partial(
    jax.jit,
    static_argnames=("vocab_size", "block_rows", "block_v", "matmul_dtype",
                     "out_dtype", "x_dtype", "vmem_limit_bytes"),
)
def _output_probability_impl(x, k, b, w_t, bias2d, *, vocab_size, block_rows,
                             block_v, matmul_dtype, out_dtype, x_dtype,
                             vmem_limit_bytes):
    B, S, D = x.shape
    D2, v_p = w_t.shape
    assert D2 == D
    assert v_p % 128 == 0, "use prepare_lm_head_weight() to pad the vocab dim"
    assert vocab_size <= v_p
    rows = B * S

    # Balanced row tiles (multiple of 16 for bf16 sublane packing); a whole
    # extra tile of dead padded rows would burn real MXU work.
    n_row_tiles = _cdiv(rows, block_rows)
    TM = _round_up(_cdiv(rows, n_row_tiles), 16)
    rows_p = _round_up(rows, TM)

    # Vocab tile: largest multiple of 128 <= block_v that divides padded V.
    TV = max(128, (min(block_v, v_p) // 128) * 128)
    while v_p % TV:
        TV -= 128

    x2d = x.reshape(rows, D)
    if x_dtype is not None:
        x2d = x2d.astype(x_dtype)           # e.g. bf16: halves x DMA + VMEM
    if rows_p != rows:
        x2d = jnp.pad(x2d, ((0, rows_p - rows), (0, 0)))

    k2d = k.reshape(1, D).astype(jnp.float32)
    b2d = b.reshape(1, D).astype(jnp.float32)

    out_dt = x.dtype if out_dtype is None else out_dtype
    grid = (rows_p // TM, v_p // TV)

    cost = pl.CostEstimate(
        flops=2 * rows_p * D * v_p + 8 * rows_p * D * grid[1],
        transcendentals=rows_p * grid[1],
        bytes_accessed=(x2d.size * x2d.dtype.itemsize
                        + grid[0] * w_t.size * w_t.dtype.itemsize
                        + grid[0] * bias2d.size * 4
                        + rows_p * v_p * jnp.dtype(out_dt).itemsize),
    )

    out2d = pl.pallas_call(
        functools.partial(_output_prob_kernel, matmul_dtype=matmul_dtype),
        out_shape=jax.ShapeDtypeStruct((rows_p, v_p), out_dt),
        grid_spec=pltpu.PrefetchScalarGridSpec(
            num_scalar_prefetch=0,
            grid=grid,
            in_specs=[
                pl.BlockSpec((TM, D), lambda i, v: (i, 0)),   # x row block (resident over v)
                pl.BlockSpec((1, D), lambda i, v: (0, 0)),    # k
                pl.BlockSpec((1, D), lambda i, v: (0, 0)),    # b
                pl.BlockSpec((D, TV), lambda i, v: (0, v)),   # W^T vocab tile (streams)
                pl.BlockSpec((1, TV), lambda i, v: (0, v)),   # bias vocab tile
            ],
            out_specs=pl.BlockSpec((TM, TV), lambda i, v: (i, v)),
        ),
        compiler_params=pltpu.CompilerParams(
            # No cross-step dependency -> both axes parallel (megacore / 2-TC
            # vocab sharding, including the single-row-block decode case).
            dimension_semantics=("parallel", "parallel"),
            vmem_limit_bytes=vmem_limit_bytes,
        ),
        cost_estimate=cost,
    )(x2d, k2d, b2d, w_t, bias2d)

    out2d = out2d[:rows, :vocab_size]
    return out2d.reshape(B, S, vocab_size)


def output_probability(x, k, b, w_t, bias2d, *, vocab_size=None,
                       block_rows=None, block_v=None,
                       matmul_dtype=jnp.bfloat16, out_dtype=None, x_dtype=None,
                       vmem_limit_bytes=None):
    """x: (B, S, D); k, b: (D,); w_t/bias2d come from prepare_lm_head_weight()."""
    defaults = _tpu_defaults()
    if block_rows is None:
        block_rows = defaults["block_rows"]
    if block_v is None:
        block_v = defaults["block_v"]
    if vmem_limit_bytes is None:
        vmem_limit_bytes = defaults["vmem_limit"]
    if vocab_size is None:
        vocab_size = w_t.shape[1]
    return _output_probability_impl(
        x, k, b, w_t, bias2d,
        vocab_size=int(vocab_size), block_rows=int(block_rows),
        block_v=int(block_v), matmul_dtype=matmul_dtype,
        out_dtype=out_dtype, x_dtype=x_dtype,
        vmem_limit_bytes=int(vmem_limit_bytes))


def _reference(x, k, b, w, bias):
    # pure-JAX f32 reference of the PyTorch forward (w in PyTorch (V, D) layout)
    mean = jnp.mean(x, axis=-1, keepdims=True)
    var = jnp.sum((x - mean) ** 2, axis=-1, keepdims=True) / (x.shape[-1] - 1)
    std = jnp.sqrt(var)
    xn = (x - mean) / (std + 1e-5)
    y = k * xn + b
    return y @ w.T + bias


if __name__ == "__main__":
    B, S, D, V = 2, 8, 32, 128

    key = jax.random.PRNGKey(0)
    kx, kk, kb, kw, kbias = jax.random.split(key, 5)

    x = jax.random.normal(kx, (B, S, D), dtype=jnp.float32)

    # Parameters matching the module's __init__ shapes (perturbed so they matter):
    k_param = jnp.ones((D,), jnp.float32) + 0.01 * jax.random.normal(kk, (D,))
    b_param = jnp.zeros((D,), jnp.float32) + 0.01 * jax.random.normal(kb, (D,))
    w_param = jax.random.normal(kw, (V, D), dtype=jnp.float32) * (1.0 / jnp.sqrt(D))
    bias_param = 0.01 * jax.random.normal(kbias, (V,), dtype=jnp.float32)

    ref = _reference(x, k_param, b_param, w_param, bias_param)

    # --- f32 matmul path (tight check of the semantics) ---
    w_t_f32, bias2d_f32 = prepare_lm_head_weight(
        w_param, bias_param, matmul_dtype=jnp.float32)
    out_f32 = output_probability(x, k_param, b_param, w_t_f32, bias2d_f32,
                                 vocab_size=V, matmul_dtype=jnp.float32)
    out_f32 = jax.block_until_ready(out_f32)
    assert out_f32.shape == (B, S, V)
    assert jnp.allclose(out_f32, ref, atol=1e-2, rtol=1e-2)

    # --- bf16 production path: bf16 weight, bf16 x load, bf16 output ---
    w_t_bf16, bias2d_bf16 = prepare_lm_head_weight(
        w_param, bias_param, matmul_dtype=jnp.bfloat16)   # done once, off hot path
    out_bf16 = output_probability(x, k_param, b_param, w_t_bf16, bias2d_bf16,
                                  vocab_size=V, matmul_dtype=jnp.bfloat16,
                                  out_dtype=jnp.bfloat16, x_dtype=jnp.bfloat16)
    out_bf16 = jax.block_until_ready(out_bf16)
    assert out_bf16.shape == (B, S, V)
    assert out_bf16.dtype == jnp.bfloat16
    assert jnp.allclose(out_bf16.astype(jnp.float32), ref, atol=1e-1, rtol=1e-1)

    print("KERNEL_OK")
</pallas_src>

<mosaic_0001>
module attributes {stable_mosaic.version = 11 : i64} {
  func.func @_output_prob_kernel(%arg0: i32, %arg1: i32, %arg2: memref<16x32xf32, #tpu.memory_space<vmem>>, %arg3: memref<1x32xf32, #tpu.memory_space<vmem>>, %arg4: memref<1x32xf32, #tpu.memory_space<vmem>>, %arg5: memref<32x128xf32, #tpu.memory_space<vmem>>, %arg6: memref<1x128xf32, #tpu.memory_space<vmem>>, %arg7: memref<16x128xf32, #tpu.memory_space<vmem>>) attributes {dimension_semantics = [#tpu.dimension_semantics<parallel>, #tpu.dimension_semantics<parallel>], iteration_bounds = array<i64: 1, 1>, scalar_prefetch = 0 : i64, scratch_operands = 0 : i64, tpu.core_type = #tpu.core_type<tc>, window_params = [{transform_indices = @transform_0, window_bounds = array<i64: 16, 32>}, {pipeline_mode = #tpu.pipeline_mode<synchronous>, transform_indices = @transform_1, window_bounds = array<i64: 1, 32>}, {pipeline_mode = #tpu.pipeline_mode<synchronous>, transform_indices = @transform_2, window_bounds = array<i64: 1, 32>}, {transform_indices = @transform_3, window_bounds = array<i64: 32, 128>}, {transform_indices = @transform_4, window_bounds = array<i64: 1, 128>}, {transform_indices = @transform_5, window_bounds = array<i64: 16, 128>}]} {
    %c0 = arith.constant 0 : index
    %c0_0 = arith.constant 0 : index
    %0 = vector.load %arg2[%c0, %c0_0] : memref<16x32xf32, #tpu.memory_space<vmem>>, vector<16x32xf32>
    %cst = arith.constant dense<0.000000e+00> : vector<16xf32>
    %1 = vector.multi_reduction <add>, %0, %cst [1] : vector<16x32xf32> to vector<16xf32>
    %2 = vector.shape_cast %1 : vector<16xf32> to vector<16x1xf32>
    %cst_1 = arith.constant 3.200000e+01 : f32
    %3 = vector.broadcast %cst_1 : f32 to vector<16x1xf32>
    %4 = arith.divf %2, %3 : vector<16x1xf32>
    %5 = vector.broadcast %4 : vector<16x1xf32> to vector<16x32xf32>
    %6 = arith.subf %0, %5 : vector<16x32xf32>
    %7 = arith.mulf %6, %6 : vector<16x32xf32>
    %cst_2 = arith.constant dense<0.000000e+00> : vector<16xf32>
    %8 = vector.multi_reduction <add>, %7, %cst_2 [1] : vector<16x32xf32> to vector<16xf32>
    %9 = vector.shape_cast %8 : vector<16xf32> to vector<16x1xf32>
    %cst_3 = arith.constant 3.100000e+01 : f32
    %10 = vector.broadcast %cst_3 : f32 to vector<16x1xf32>
    %11 = arith.divf %9, %10 : vector<16x1xf32>
    %12 = math.sqrt %11 : vector<16x1xf32>
    %cst_4 = arith.constant 9.99999974E-6 : f32
    %13 = vector.broadcast %cst_4 : f32 to vector<16x1xf32>
    %14 = arith.addf %12, %13 : vector<16x1xf32>
    %15 = vector.broadcast %14 : vector<16x1xf32> to vector<16x32xf32>
    %16 = arith.divf %6, %15 : vector<16x32xf32>
    %c0_5 = arith.constant 0 : index
    %c0_6 = arith.constant 0 : index
    %17 = vector.load %arg3[%c0_5, %c0_6] : memref<1x32xf32, #tpu.memory_space<vmem>>, vector<1x32xf32>
    %18 = vector.broadcast %17 : vector<1x32xf32> to vector<16x32xf32>
    %19 = arith.mulf %18, %16 : vector<16x32xf32>
    %c0_7 = arith.constant 0 : index
    %c0_8 = arith.constant 0 : index
    %20 = vector.load %arg4[%c0_7, %c0_8] : memref<1x32xf32, #tpu.memory_space<vmem>>, vector<1x32xf32>
    %21 = vector.broadcast %20 : vector<1x32xf32> to vector<16x32xf32>
    %22 = arith.addf %19, %21 : vector<16x32xf32>
    %c0_9 = arith.constant 0 : index
    %c0_10 = arith.constant 0 : index
    %23 = vector.load %arg5[%c0_9, %c0_10] : memref<32x128xf32, #tpu.memory_space<vmem>>, vector<32x128xf32>
    %cst_11 = arith.constant dense<0.000000e+00> : vector<16x128xf32>
    %24 = tpu.matmul %22, %23, %cst_11 {dimension_numbers = #tpu.dot_dimension_numbers<[1], [0], [0], [1], [0, 0, 1, 1], [], []>} : vector<16x32xf32>, vector<32x128xf32>, vector<16x128xf32> -> vector<16x128xf32>
    %c0_12 = arith.constant 0 : index
    %c0_13 = arith.constant 0 : index
    %25 = vector.load %arg6[%c0_12, %c0_13] : memref<1x128xf32, #tpu.memory_space<vmem>>, vector<1x128xf32>
    %26 = vector.broadcast %25 : vector<1x128xf32> to vector<16x128xf32>
    %27 = arith.addf %24, %26 : vector<16x128xf32>
    %c0_14 = arith.constant 0 : index
    %c0_15 = arith.constant 0 : index
    %28 = vector.load %arg7[%c0_14, %c0_15] : memref<16x128xf32, #tpu.memory_space<vmem>>, vector<16x128xf32>
    tpu.vector_store %arg7[%c0_14, %c0_15], %27 {strides = array<i32>} : memref<16x128xf32, #tpu.memory_space<vmem>>, vector<16x128xf32>,
    return
  }
  func.func @transform_0(%arg0: i32, %arg1: i32) -> (i32, i32) {
    %c0_i32 = arith.constant 0 : i32
    %c0_i32_0 = arith.constant 0 : i32
    return %arg0, %c0_i32 : i32, i32
  }
  func.func @transform_1(%arg0: i32, %arg1: i32) -> (i32, i32) {
    %c0_i32 = arith.constant 0 : i32
    %c0_i32_0 = arith.constant 0 : i32
    %c0_i32_1 = arith.constant 0 : i32
    return %c0_i32, %c0_i32_0 : i32, i32
  }
  func.func @transform_2(%arg0: i32, %arg1: i32) -> (i32, i32) {
    %c0_i32 = arith.constant 0 : i32
    %c0_i32_0 = arith.constant 0 : i32
    %c0_i32_1 = arith.constant 0 : i32
    return %c0_i32, %c0_i32_0 : i32, i32
  }
  func.func @transform_3(%arg0: i32, %arg1: i32) -> (i32, i32) {
    %c0_i32 = arith.constant 0 : i32
    %c0_i32_0 = arith.constant 0 : i32
    return %c0_i32, %arg1 : i32, i32
  }
  func.func @transform_4(%arg0: i32, %arg1: i32) -> (i32, i32) {
    %c0_i32 = arith.constant 0 : i32
    %c0_i32_0 = arith.constant 0 : i32
    return %c0_i32, %arg1 : i32, i32
  }
  func.func @transform_5(%arg0: i32, %arg1: i32) -> (i32, i32) {
    %c0_i32 = arith.constant 0 : i32
    return %arg0, %arg1 : i32, i32
  }
}

</mosaic_0001>

<bundles_post_ra>
// kernel: _output_probability_impl.1
= control target key start
LH: loop header
LB: loop body
LE: loop exit
PB: predicated region body
PF: predicated region fallthrough
CT: control target
= control target key end

     0   :  { %10 = vsyncpa [#allocation3], 0  ;;  %s570_s0 = inlined_call_operand.hbm [shape: f32[16,32], index: 0, kind: input, shape index: {}]   ;;  %s571_s1 = inlined_call_operand.hbm [shape: f32[1,32], index: 1, kind: input, shape index: {}]   ;;  %s572_s2 = inlined_call_operand.hbm [shape: f32[1,32], index: 2, kind: input, shape index: {}]   ;;  %s573_s3 = inlined_call_operand.hbm [shape: f32[32,128], index: 3, kind: input, shape index: {}]   ;;  %s574_s4 = inlined_call_operand.hbm [shape: f32[1,128], index: 4, kind: input, shape index: {}]   ;;  %s575_s5 = inlined_call_operand.hbm [shape: f32[16,128], index: 5, kind: output, shape index: {}]  }
   0x1   :  { %11 = vsyncpa [#allocation6], 0 }
   0x2   :  { %12 = vsyncpa [#allocation9], 0 }
   0x3   :  { %13 = vsyncpa [#allocation4], 0  ;;  %s445_s18 = smov [#allocation5]   ;;  %s305_s22 = scalar_lea.hbm %s571_s1, 16 }
   0x4   :  { %s32_s19 = sshll.u32 %s445_s18, 4  ;;  %p306_p0 = scmp.ne.s32.totalorder %s571_s1, %s305_s22  ;;  %s33_s19 = int_to_ptr.vmem [resolvable:$true] %s32_s19 }
   0x5   :  { %p309_p1 = scmp.lt.u32.totalorder %s305_s22, %s571_s1 }
   0x7   :  { %p311_p2 = pnand %p309_p1, %p306_p0 }
   0x9   :  { %314 = shalt.err (!%p311_p2)
}
   0xa   :  { %s315_s27 = scalar_lea.vmem %s33_s19, 16  ;;  %s319_s28 = scalar_lea.vmem %s33_s19, 32 }
   0xb   :  { %p316_p3 = scmp.ne.s32.totalorder %s33_s19, %s315_s27  ;;  %p320_p4 = scmp.lt.s32.totalorder %s33_s19, %s33_s19 }
   0xc   :  { %p321_p5 = scmp.lt.s32.totalorder %s319_s28, %s315_s27 }
   0xe   :  { %p322_p6 = por %p321_p5, %p320_p4 }
  0x10   :  { %p323_p7 = pnand %p322_p6, %p316_p3 }
  0x12   :  { %326 = shalt.err (!%p323_p7)
}
  0x13   :  { %35 = dma.hbm_to_vmem [thread:$0]  %s571_s1, 16, %s33_s19, [#allocation6]  }
  0x14   :  { %s446_s6 = smov [#allocation8]   ;;  %s447_s8 = smov [#allocation2]  }
  0x15   :  { %s51_s7 = sshll.u32 %s446_s6, 4  ;;  %s19_s9 = sshll.u32 %s447_s8, 4  ;;  %s52_s7 = int_to_ptr.vmem [resolvable:$true] %s51_s7  ;;  %s20_s9 = int_to_ptr.vmem [resolvable:$true] %s19_s9 }
  0x16   :  { %s327_s12 = scalar_lea.hbm %s573_s3, 512 }
  0x17   :  { %p328_p8 = scmp.ne.s32.totalorder %s573_s3, %s327_s12  ;;  %p331_p9 = scmp.lt.u32.totalorder %s327_s12, %s573_s3 }
  0x19   :  { %p333_p10 = pnand %p331_p9, %p328_p8 }
  0x1b   :  { %336 = shalt.err (!%p333_p10)
}
  0x1c   :  { %s337_s1 = scalar_lea.vmem %s52_s7, 512  ;;  %p342_p12 = scmp.lt.s32.totalorder %s52_s7, %s52_s7 }
  0x1d   :  { %p338_p11 = scmp.ne.s32.totalorder %s52_s7, %s337_s1  ;;  %p343_p13 = scmp.lt.s32.totalorder %s337_s1, %s337_s1 }
  0x1f   :  { %p344_p0 = por %p343_p13, %p342_p12 }
  0x21   :  { %p345_p1 = pnand %p344_p0, %p338_p11 }
  0x23   :  { %348 = shalt.err (!%p345_p1)
}
  0x24   :  { %s448_s17 = smov 128   ;;  %s449_s18 = smov 8  }
  0x25   :  { %57 = dma.hbm_to_vmem [thread:$0]  %s573_s3, 512, %s52_s7, [#allocation9], %s448_s17, %s448_s17, %s449_s18  }
  0x26   :  { %s349_s23 = scalar_lea.hbm %s570_s0, 256 }
  0x27   :  { %p350_p2 = scmp.ne.s32.totalorder %s570_s0, %s349_s23  ;;  %p353_p3 = scmp.lt.u32.totalorder %s349_s23, %s570_s0 }
  0x29   :  { %p355_p4 = pnand %p353_p3, %p350_p2 }
  0x2b   :  { %358 = shalt.err (!%p355_p4)
}
  0x2c   :  { %s359_s28 = scalar_lea.vmem %s20_s9, 256  ;;  %p364_p6 = scmp.lt.s32.totalorder %s20_s9, %s20_s9 }
  0x2d   :  { %p360_p5 = scmp.ne.s32.totalorder %s20_s9, %s359_s28  ;;  %p365_p7 = scmp.lt.s32.totalorder %s359_s28, %s359_s28 }
  0x2f   :  { %p366_p8 = por %p365_p7, %p364_p6 }
  0x31   :  { %p367_p9 = pnand %p366_p8, %p360_p5 }
  0x33   :  { %370 = shalt.err (!%p367_p9)
}
  0x34   :  { %25 = dma.hbm_to_vmem [thread:$0]  %s570_s0, 256, %s20_s9, [#allocation3], %s448_s17, %s448_s17, %s449_s18  }
  0x35   :  { %s450_s30 = smov [#allocation7]   ;;  %s451_s7 = smov [#allocation10]  }
  0x36   :  { %s42_s6 = sshll.u32 %s450_s30, 4  ;;  %s64_s8 = sshll.u32 %s451_s7, 4  ;;  %s43_s6 = int_to_ptr.vmem [resolvable:$true] %s42_s6  ;;  %s65_s8 = int_to_ptr.vmem [resolvable:$true] %s64_s8 }
  0x37   :  { %s371_s12 = scalar_lea.hbm %s572_s2, 16 }
  0x38   :  { %p372_p10 = scmp.ne.s32.totalorder %s572_s2, %s371_s12  ;;  %p375_p11 = scmp.lt.u32.totalorder %s371_s12, %s572_s2 }
  0x3a   :  { %p377_p12 = pnand %p375_p11, %p372_p10 }
  0x3c   :  { %380 = shalt.err (!%p377_p12)
}
  0x3d   :  { %s381_s0 = scalar_lea.vmem %s43_s6, 16  ;;  %s385_s9 = scalar_lea.vmem %s43_s6, 32 }
  0x3e   :  { %p382_p13 = scmp.ne.s32.totalorder %s43_s6, %s381_s0  ;;  %p386_p0 = scmp.lt.s32.totalorder %s43_s6, %s43_s6 }
  0x3f   :  { %p387_p1 = scmp.lt.s32.totalorder %s385_s9, %s381_s0 }
  0x41   :  { %p388_p2 = por %p387_p1, %p386_p0 }
  0x43   :  { %p389_p3 = pnand %p388_p2, %p382_p13 }
  0x45   :  { %392 = shalt.err (!%p389_p3)
}
  0x46   :  { %45 = dma.hbm_to_vmem [thread:$0]  %s572_s2, 16, %s43_s6, [#allocation6]  }
  0x47   :  { %s393_s22 = scalar_lea.hbm %s574_s4, 16 }
  0x48   :  { %p394_p4 = scmp.ne.s32.totalorder %s574_s4, %s393_s22  ;;  %p397_p5 = scmp.lt.u32.totalorder %s393_s22, %s574_s4 }
  0x4a   :  { %p399_p6 = pnand %p397_p5, %p394_p4 }
  0x4c   :  { %402 = shalt.err (!%p399_p6)
}
  0x4d   :  { %s403_s27 = scalar_lea.vmem %s65_s8, 16  ;;  %s407_s28 = scalar_lea.vmem %s65_s8, 32 }
  0x4e   :  { %p404_p7 = scmp.ne.s32.totalorder %s65_s8, %s403_s27  ;;  %p408_p8 = scmp.lt.s32.totalorder %s65_s8, %s65_s8 }
  0x4f   :  { %p409_p9 = scmp.lt.s32.totalorder %s407_s28, %s403_s27 }
  0x51   :  { %p410_p10 = por %p409_p9, %p408_p8 }
  0x53   :  { %p411_p11 = pnand %p410_p10, %p404_p7 }
  0x55   :  { %414 = shalt.err (!%p411_p11)
}
  0x56   :  { %67 = dma.hbm_to_vmem [thread:$0]  %s574_s4, 16, %s65_s8, [#allocation9]  }
  0x57   :  { %437 = dma.done.wait [#allocation3], 256  }
  0x58   :  { %438 = vsyncadd [#allocation3], 4294967040 }
  0x59   :  { %439 = dma.done.wait [#allocation6], 32  }
  0x5a   :  { %440 = vsyncadd [#allocation6], 4294967264 }
  0x5b   :  { %441 = dma.done.wait [#allocation9], 528  }
  0x5c   :  { %442 = vsyncadd [#allocation9], 4294966768  ;;  %vm85_vm0 = vcmask 261120   ;;  %v83_v0 = vld [vmem:[#allocation2] sm:$0xff]  ;;  %v84_v1 = vld [vmem:[#allocation2 + $0x8] sm:$0xff]  ;;  %s452_s4 = smov [#allocation11]  }
  0x5d   :  { %v86_v2 = vsel %vm85_vm0, %v83_v0, 0.0  ;;  %v89_v3 = vsel %vm85_vm0, %v84_v1, 0.0  ;;  %v146_v14 = vld [vmem:[#allocation8] sm:$0xff]  ;;  %v147_v15 = vld [vmem:[#allocation8 + $0x8] sm:$0xff]  ;;  %v148_v16 = vld [vmem:[#allocation8 + $0x10] sm:$0xff]  ;;  %s245_s29 = sshll.u32 %s452_s4, 4  ;;  %s246_s29 = int_to_ptr.vmem [resolvable:$true] %s245_s29 }
  0x5e   :  { %87 = vadd.xlane.f32.xlu0 %v86_v2  ;;  %v281_v17 = vpack.c.bf16 %v147_v15, %v146_v14  ;;  %v149_v18 = vld [vmem:[#allocation8 + $0x18] sm:$0xff]  ;;  %v261_v46 = vld [vmem:[#allocation10] ss:$0 sm:$0xff]  ;;  %s415_s30 = scalar_lea.vmem %s246_s29, 256  ;;  %p420_p13 = scmp.lt.s32.totalorder %s246_s29, %s246_s29 }
  0x5f   :  { %v285_v19 = vpack.c.bf16 %v149_v18, %v148_v16  ;;  %v259_v37 = vld [vmem:[#allocation5] ss:$0 sm:$0xff]  ;;  %v260_v39 = vld [vmem:[#allocation7] ss:$0 sm:$0xff]  ;;  %p416_p12 = scmp.ne.s32.totalorder %s246_s29, %s415_s30  ;;  %p421_p0 = scmp.lt.s32.totalorder %s415_s30, %s415_s30 }
  0x60   :  { %282 = vmatprep.subr.bf16.mxu0 %v281_v17 }
  0x61   :  { %284 = vmatpush3.bf16.msra.mxu0 %v281_v17  ;;  %p422_p1 = por %p421_p0, %p420_p13 }
  0x62   :  { %90 = vadd.xlane.f32.xlu0 %v89_v3  ;;  %286 = vmatprep.subr.bf16.mxu0 %v285_v19 }
  0x63   :  { %p423_p2 = pnand %p422_p1, %p416_p12 }
  0x65   :  { %288 = vmatpush3.bf16.msra.mxu0 %v285_v19 }
  0xeb   :  { %v88_v4 = vpop.xlane.xlu0 %87 }
  0xec   :  { %v93_v5 = vmul.f32 0.03125, %v88_v4 }
  0xee   :  { %v95_v6 = vsub.f32 %v83_v0, %v93_v5 }
  0xef   :  { %v91_v7 = vpop.xlane.xlu0 %90 }
  0xf0   :  { %v94_v8 = vmul.f32 0.03125, %v91_v7  ;;  %v97_v9 = vmul.f32 %v95_v6, %v95_v6 }
  0xf2   :  { %v96_v10 = vsub.f32 %v84_v1, %v94_v8  ;;  %v99_v11 = vsel %vm85_vm0, %v97_v9, 0.0 }
  0xf3   :  { %100 = vadd.xlane.f32.xlu1 %v99_v11 }
  0xf4   :  { %v98_v12 = vmul.f32 %v96_v10, %v96_v10 }
  0xf6   :  { %v102_v13 = vsel %vm85_vm0, %v98_v12, 0.0 }
  0xf7   :  { %103 = vadd.xlane.f32.xlu1 %v102_v13 }
 0x180   :  { %v101_v20 = vpop.xlane.xlu1 %100 }
 0x181   :  { %v106_v21 = vmul.f32 0.032258064, %v101_v20 }
 0x183   :  { %297 = vrsqrt.f32 %v106_v21  ;;  %vm110_vm1 = vcmp.eq.f32.partialorder %v106_v21, inf  ;;  %v113_v26 = vand.u32 2147483648, %v106_v21  ;;  %vm112_vm2 = vcmp.eq.f32.partialorder %v106_v21, 0.0 }
 0x184   :  { %v104_v22 = vpop.xlane.xlu1 %103 }
 0x185   :  { %v107_v23 = vmul.f32 0.032258064, %v104_v22 }
 0x187   :  { %299 = vrsqrt.f32 %v107_v23  ;;  %vm117_vm3 = vcmp.eq.f32.partialorder %v107_v23, inf  ;;  %v120_v32 = vand.u32 2147483648, %v107_v23  ;;  %vm119_vm4 = vcmp.eq.f32.partialorder %v107_v23, 0.0 }
 0x18d   :  { %v298_v24 = vpop.eup %297 }
 0x18e   :  { %v109_v25 = vmul.f32 %v298_v24, %v106_v21 }
 0x190   :  { %v111_v27 = vsel %vm110_vm1, %v106_v21, %v109_v25 }
 0x191   :  { %v300_v28 = vpop.eup %299  ;;  %v114_v29 = vsel %vm112_vm2, %v113_v26, %v111_v27 }
 0x192   :  { %v116_v30 = vmul.f32 %v300_v28, %v107_v23  ;;  %v122_v31 = vadd.f32 1e-05, %v114_v29 }
 0x194   :  { %v118_v33 = vsel %vm117_vm3, %v107_v23, %v116_v30  ;;  %301 = vrcp.f32 %v122_v31 }
 0x195   :  { %v121_v34 = vsel %vm119_vm4, %v120_v32, %v118_v33 }
 0x196   :  { %v123_v35 = vadd.f32 1e-05, %v121_v34 }
 0x198   :  { %303 = vrcp.f32 %v123_v35 }
 0x19e   :  { %v302_v36 = vpop.eup %301 }
 0x19f   :  { %v125_v38 = vmul.f32 %v302_v36, %v95_v6 }
 0x1a1   :  { %v135_v40 = vmul.f32 %v259_v37, %v125_v38 }
 0x1a2   :  { %v304_v41 = vpop.eup %303 }
 0x1a3   :  { %v127_v42 = vmul.f32 %v304_v41, %v96_v10  ;;  %v144_v43 = vadd.f32 %v260_v39, %v135_v40 }
 0x1a5   :  { %v136_v44 = vmul.f32 %v259_v37, %v127_v42  ;;  %278 = vmatprep.mubr.msk.f32.mxu0 %vm85_vm0, %v144_v43 }
 0x1a7   :  { %v145_v45 = vadd.f32 %v260_v39, %v136_v44 }
 0x1a9   :  { %279 = vmatmul.mubr.msk.f32.vlgmr.msra.gmra.mrb[0].mxu0 %vm85_vm0, %v145_v45 }
 0x27c   :  { %v280_v47 = vpop.f32.mrb[0].mxu0 }
 0x27d   :  { %v235_v48 = vadd.f32 %v280_v47, %v261_v46  ;;  %v229_v49 = vpop.f32.mrb[1].mxu0 }
 0x27e   :  { %v230_v50 = vadd.f32 %v261_v46, %v229_v49 }
 0x27f   :  { %239 = vst [vmem:[#allocation11 + $0x8] sm:$0xff] %v235_v48 }
 0x280   :  { %238 = vst [vmem:[#allocation11] sm:$0xff] %v230_v50 }
 0x281   :  { %426 = shalt.err (!%p423_p2)
}
 0x282   :  { %s427_s8 = scalar_lea.hbm %s575_s5, 256 }
 0x283   :  { %p428_p3 = scmp.ne.s32.totalorder %s575_s5, %s427_s8  ;;  %p431_p4 = scmp.lt.u32.totalorder %s427_s8, %s575_s5 }
 0x285   :  { %p433_p5 = pnand %p431_p4, %p428_p3 }
 0x287   :  { %436 = shalt.err (!%p433_p5)
}
 0x288   :  { %251 = dma.vmem_to_hbm [thread:$0]  %s246_s29, 256, %s575_s5, [#allocation4], %s448_s17, %s448_s17, %s449_s18  }
 0x289   :  { %443 = dma.done.wait [#allocation4], 256  }
 0x28a   :  { %444 = vsyncadd [#allocation4], 4294967040 }
 0x28b   :  { %255 = vsyncpa [#allocation3], 1 }
 0x28c   :  { %256 = vsyncpa [#allocation6], 1 }
 0x28d   :  { %257 = vsyncpa [#allocation9], 1 }
 0x28e   :  { %258 = vsyncpa [#allocation4], 1 }

</bundles_post_ra>
